<compile_context>
chip_gen: v7x
topology: tpu7x:2x2x1
jax: 0.10.0
libtpu: 0.0.40
codegen_flags: <defaults>
</compile_context>

<pallas_src>
import functools

import jax
import jax.numpy as jnp
from jax.experimental import pallas as pl
from jax.experimental.pallas import tpu as pltpu


@functools.lru_cache(maxsize=None)
def _tpu_config():
    """(vmem_capacity_bytes, tensorcores_per_device), with safe fallbacks."""
    vmem_cap = 64 * 1024 * 1024        # conservative default (v7x-sized)
    num_cores = 1
    try:
        info = pltpu.get_tpu_info()
        cap = getattr(info, "vmem_capacity_bytes", None)
        if isinstance(cap, int) and cap > 0:
            vmem_cap = cap
        for attr in ("num_cores", "tensorcore_count", "core_count"):
            v = getattr(info, attr, None)
            if isinstance(v, int) and v > 0:
                num_cores = v
                break
    except Exception:
        pass
    if num_cores == 1:
        try:
            v = getattr(jax.devices()[0], "num_cores", None)
            if isinstance(v, int) and v > 0:
                num_cores = v
        except Exception:
            pass
    return int(vmem_cap), max(1, min(int(num_cores), 2))


def _pick_tile_n(n_rows, d, itemsize, has_mask, stream_budget, multiple,
                 target_block_bytes=4 * 1024 * 1024):
    """Row-tile size targeting ~4 MiB input blocks within the VMEM budget."""
    # Bytes of VMEM per streamed row: 2 inputs x 2 pipeline buffers, plus the
    # mask block whose lane dim pads to 128 (=> ~512 B/row/buffer in f32).
    bytes_per_row = 2 * 2 * d * itemsize
    if has_mask:
        bytes_per_row += 2 * 128 * 4
    fit_rows = max(stream_budget // bytes_per_row, multiple)
    target_rows = max(target_block_bytes // max(d * itemsize, 1), multiple)
    tile = int(min(fit_rows, target_rows))
    tile = max((tile // multiple) * multiple, multiple)
    cover = ((n_rows + multiple - 1) // multiple) * multiple   # N rounded up
    return int(min(tile, cover))


def _make_kernel(has_mask, tile_n, tiles_per_core, n_rows, stats):
    """Build the streaming reduction kernel, closed over static config."""
    n_sub = tile_n // 8
    need_sq = ("sq" in stats) or ("huber" in stats)
    need_abs = ("abs" in stats) or ("huber" in stats)

    def accumulate(d, out_refs):
        # (tile_n, D) -> (tile_n/8, 8, D): the axis-0 reduce is pure vreg adds;
        # the cross-sublane collapse of the (8, D) partials happens once, in
        # the JAX wrapper, not per grid step.
        d3 = d.reshape(n_sub, 8, d.shape[-1])
        dsq = d3 * d3 if need_sq else None
        dab = jnp.abs(d3) if need_abs else None
        for name, ref in zip(stats, out_refs):
            if name == "sq":
                v = dsq
            elif name == "abs":
                v = dab
            else:  # 'huber' == SmoothL1 with beta=1
                v = jnp.where(dab < 1.0, 0.5 * dsq, dab - 0.5)
            ref[...] += jnp.sum(v, axis=0)[None]

    def kernel(*refs):
        n_in = 3 if has_mask else 2
        mo_ref, tgt_ref = refs[0], refs[1]
        mask_ref = refs[2] if has_mask else None
        out_refs = refs[n_in:]

        i = pl.program_id(0)   # core-split axis ("parallel")
        j = pl.program_id(1)   # streaming reduction axis ("arbitrary")

        @pl.when(j == 0)
        def _init():
            for ref in out_refs:
                ref[...] = jnp.zeros_like(ref)

        d = mo_ref[...].astype(jnp.float32) - tgt_ref[...].astype(jnp.float32)
        if has_mask:
            d = d * mask_ref[...]          # (tile_n, 1) lane-broadcast

        tile_start = (i * tiles_per_core + j) * tile_n
        limit = n_rows - tile_start        # valid rows in this tile

        # Fast path: fully interior tile -> no iota / compare / select.
        @pl.when(limit >= tile_n)
        def _interior():
            accumulate(d, out_refs)

        # Slow path: ragged last tile or a clamped over-provisioned grid step
        # (limit <= 0).  Out-of-range rows may hold garbage (even NaN/Inf)
        # from the partial DMA, so kill them with a select (not a multiply).
        @pl.when(limit < tile_n)
        def _ragged():
            rows = jax.lax.broadcasted_iota(jnp.int32, (tile_n, 1), 0)
            accumulate(jnp.where(rows < limit, d, 0.0), out_refs)

    return kernel


@functools.partial(
    jax.jit,
    static_argnames=("loss_type", "weighting_scheme", "tile_n", "compute_mae"))
def diffusion_loss(model_output, target, timesteps=None, mask=None, *,
                   loss_type="mse", weighting_scheme="uniform",
                   tile_n=None, compute_mae=True):
    """JAX/Pallas equivalent of DiffusionLoss.forward.

    Args:
      model_output: (B, L, D) predictions (bf16/f32 kept in native dtype).
      target:       (B, L, D) targets.
      timesteps:    optional (B,) timesteps for 'snr'/'min_snr' weighting.
      mask:         optional (B, L) mask.
      compute_mae:  set False to skip the |d| accumulator (drops 'mae').
    Returns:
      dict with 'loss', 'mse' (and 'mae' unless skipped), scalar f32.
    """
    if loss_type not in ("mse", "l1", "huber"):
        raise ValueError(f"Unknown loss type: {loss_type}")

    B, L, D = model_output.shape
    N = B * L

    mo = model_output.reshape(N, D)     # native dtype: kernel is HBM-bound
    tg = target.reshape(N, D)
    has_mask = mask is not None
    if has_mask:
        mk = mask.reshape(N, 1).astype(jnp.float32)

    # Generation-aware VMEM budget (v7x has 64 MiB physical; v5e/v6e 128 MiB).
    vmem_cap, num_cores_hw = _tpu_config()
    vmem_limit = 44 * 1024 * 1024 if vmem_cap <= 64 * 1024 * 1024 \
        else 64 * 1024 * 1024
    stream_budget = vmem_limit - 4 * 1024 * 1024   # headroom for accumulators

    itemsize = jnp.dtype(model_output.dtype).itemsize
    multiple = {1: 32, 2: 16, 4: 8}.get(itemsize, 8)   # sublane packing
    cover = ((N + multiple - 1) // multiple) * multiple

    if tile_n is None:
        tile_n = _pick_tile_n(N, D, itemsize, has_mask, stream_budget, multiple)
    else:
        tile_n = max((min(int(tile_n), cover) // multiple) * multiple, multiple)

    num_tiles = (N + tile_n - 1) // tile_n
    num_cores = max(1, min(num_cores_hw, num_tiles))
    tiles_per_core = (num_tiles + num_cores - 1) // num_cores

    # Which per-element statistics the kernel must accumulate.
    stats = ["sq"]
    if compute_mae or loss_type == "l1":
        stats.append("abs")
    if loss_type == "huber":
        stats.append("huber")
    stats = tuple(stats)

    def row_block(i, j):
        # Clamp so over-provisioned grid steps never index past the array;
        # the in-kernel row mask zeroes their contribution.
        return (jnp.minimum(i * tiles_per_core + j, num_tiles - 1), 0)

    in_specs = [pl.BlockSpec((tile_n, D), row_block),
                pl.BlockSpec((tile_n, D), row_block)]
    inputs = [mo, tg]
    if has_mask:
        in_specs.append(pl.BlockSpec((tile_n, 1), row_block))
        inputs.append(mk)
    # TODO(synk): if profiling with small D shows exposed DMA, sweep
    # pipeline_mode=pl.Buffered(3) on the two streaming input BlockSpecs.

    out_shape = tuple(jax.ShapeDtypeStruct((num_cores, 8, D), jnp.float32)
                      for _ in stats)
    out_specs = tuple(pl.BlockSpec((1, 8, D), lambda i, j: (i, 0, 0))
                      for _ in stats)

    parts = pl.pallas_call(
        _make_kernel(has_mask, tile_n, tiles_per_core, N, stats),
        out_shape=out_shape,
        grid_spec=pltpu.PrefetchScalarGridSpec(
            num_scalar_prefetch=0,
            grid=(num_cores, tiles_per_core),
            in_specs=in_specs,
            out_specs=out_specs,
        ),
        compiler_params=pltpu.CompilerParams(
            # TODO(synk): if v7x profiling shows a single-core sweep, switch
            # the leading axis to pltpu.CORE_PARALLEL.
            dimension_semantics=("parallel", "arbitrary"),
            vmem_limit_bytes=vmem_limit,
        ),
    )(*inputs)

    sums = {name: jnp.sum(p) for name, p in zip(stats, parts)}
    count = jnp.float32(N * D)              # torch 'mean' counts ALL elements
    mse = sums["sq"] / count
    mae = sums["abs"] / count if "abs" in sums else None

    if loss_type == "mse":
        loss = mse
    elif loss_type == "l1":
        loss = mae
    else:  # huber
        loss = sums["huber"] / count

    if timesteps is not None and weighting_scheme != "uniform":
        snr = 1.0 / (timesteps.astype(jnp.float32) + 1e-8)
        if weighting_scheme == "min_snr":
            snr = jnp.minimum(snr, 5.0)
        w = snr / jnp.mean(snr)
        # torch: scalar loss broadcast * weights, then .mean() == loss*mean(w)
        loss = loss * jnp.mean(w)

    out = {"loss": loss, "mse": mse}
    if mae is not None:
        out["mae"] = mae
    return out


def _reference(model_output, target, mask=None):
    """Pure-JAX reference matching the PyTorch semantics (f32 math)."""
    mo = model_output.astype(jnp.float32)
    tg = target.astype(jnp.float32)
    if mask is not None:
        m = mask.astype(jnp.float32)[..., None]
        mo = mo * m
        tg = tg * m
    d = mo - tg
    return {"mse": jnp.mean(d * d), "mae": jnp.mean(jnp.abs(d)), "d": d}


if __name__ == "__main__":
    key = jax.random.PRNGKey(0)
    k1, k2, k3, k4, k5 = jax.random.split(key, 5)

    # Case 1: small shape, masked, single tile (auto tile_n).
    B, L, D = 2, 8, 32
    mo = jax.random.normal(k1, (B, L, D), jnp.float32)
    tg = jax.random.normal(k2, (B, L, D), jnp.float32)
    mask = (jax.random.uniform(k3, (B, L)) > 0.3).astype(jnp.float32)

    out = diffusion_loss(mo, tg, mask=mask)
    out = jax.tree_util.tree_map(jax.block_until_ready, out)
    ref = _reference(mo, tg, mask)
    assert jnp.allclose(out["loss"], ref["mse"], rtol=1e-5, atol=1e-6)
    assert jnp.allclose(out["mse"], ref["mse"], rtol=1e-5, atol=1e-6)
    assert jnp.allclose(out["mae"], ref["mae"], rtol=1e-5, atol=1e-6)

    # Case 2: bf16 inputs, no mask, multi-tile grid with a ragged last tile
    # (exercises the interior fast path + ragged select + clamped index map).
    B2, L2, D2 = 1, 1100, 256
    mo2 = jax.random.normal(k4, (B2, L2, D2), jnp.float32).astype(jnp.bfloat16)
    tg2 = jax.random.normal(k5, (B2, L2, D2), jnp.float32).astype(jnp.bfloat16)

    out2 = diffusion_loss(mo2, tg2, tile_n=128)
    out2 = jax.tree_util.tree_map(jax.block_until_ready, out2)
    ref2 = _reference(mo2, tg2)
    assert jnp.allclose(out2["mse"], ref2["mse"], rtol=1e-4, atol=1e-5)
    assert jnp.allclose(out2["mae"], ref2["mae"], rtol=1e-4, atol=1e-5)
    assert jnp.allclose(out2["loss"], ref2["mse"], rtol=1e-4, atol=1e-5)

    # Case 3: f32 inputs, masked, multi-tile.
    mo3 = mo2.astype(jnp.float32)
    tg3 = tg2.astype(jnp.float32)
    mask3 = (jax.random.uniform(k3, (B2, L2)) > 0.5).astype(jnp.float32)

    out3 = diffusion_loss(mo3, tg3, mask=mask3, tile_n=128)
    out3 = jax.tree_util.tree_map(jax.block_until_ready, out3)
    ref3 = _reference(mo3, tg3, mask3)
    assert jnp.allclose(out3["mse"], ref3["mse"], rtol=1e-5, atol=1e-6)
    assert jnp.allclose(out3["mae"], ref3["mae"], rtol=1e-5, atol=1e-6)

    # Case 4: huber loss + min_snr timestep weighting on the small masked case.
    ts = jax.random.uniform(k3, (B,), jnp.float32, minval=0.05, maxval=1.0)
    out4 = diffusion_loss(mo, tg, timesteps=ts, mask=mask,
                          loss_type="huber", weighting_scheme="min_snr")
    out4 = jax.tree_util.tree_map(jax.block_until_ready, out4)
    d4 = ref["d"]
    a4 = jnp.abs(d4)
    huber_ref = jnp.mean(jnp.where(a4 < 1.0, 0.5 * d4 * d4, a4 - 0.5))
    snr = jnp.minimum(1.0 / (ts + 1e-8), 5.0)
    loss4_ref = huber_ref * jnp.mean(snr / jnp.mean(snr))
    assert jnp.allclose(out4["loss"], loss4_ref, rtol=1e-5, atol=1e-6)
    assert jnp.allclose(out4["mse"], ref["mse"], rtol=1e-5, atol=1e-6)

    print("KERNEL_OK")
</pallas_src>

<mosaic_0001>
module attributes {stable_mosaic.version = 11 : i64} {
  func.func @kernel(%arg0: i32, %arg1: i32, %arg2: memref<16x32xf32, #tpu.memory_space<vmem>>, %arg3: memref<16x32xf32, #tpu.memory_space<vmem>>, %arg4: memref<16x1xf32, #tpu.memory_space<vmem>>, %arg5: memref<1x8x32xf32, #tpu.memory_space<vmem>>, %arg6: memref<1x8x32xf32, #tpu.memory_space<vmem>>) attributes {dimension_semantics = [#tpu.dimension_semantics<parallel>, #tpu.dimension_semantics<arbitrary>], iteration_bounds = array<i64: 1, 1>, scalar_prefetch = 0 : i64, scratch_operands = 0 : i64, tpu.core_type = #tpu.core_type<tc>, window_params = [{transform_indices = @transform_0, window_bounds = array<i64: 16, 32>}, {transform_indices = @transform_1, window_bounds = array<i64: 16, 32>}, {transform_indices = @transform_2, window_bounds = array<i64: 16, 1>}, {transform_indices = @transform_3, window_bounds = array<i64: 1, 8, 32>}, {transform_indices = @transform_4, window_bounds = array<i64: 1, 8, 32>}]} {
    %c0_i32 = arith.constant 0 : i32
    %0 = arith.cmpi eq, %arg1, %c0_i32 : i32
    %1 = arith.extui %0 : i1 to i32
    %c0_i32_0 = arith.constant 0 : i32
    %2 = arith.cmpi ne, %1, %c0_i32_0 : i32
    scf.if %2 {
      %cst = arith.constant 0.000000e+00 : f32
      %19 = vector.broadcast %cst : f32 to vector<1x8x32xf32>
      %c0_11 = arith.constant 0 : index
      %c0_12 = arith.constant 0 : index
      %c0_13 = arith.constant 0 : index
      %20 = vector.load %arg5[%c0_11, %c0_12, %c0_13] : memref<1x8x32xf32, #tpu.memory_space<vmem>>, vector<1x8x32xf32>
      tpu.vector_store %arg5[%c0_11, %c0_12, %c0_13], %19 {strides = array<i32>} : memref<1x8x32xf32, #tpu.memory_space<vmem>>, vector<1x8x32xf32>,
      %cst_14 = arith.constant 0.000000e+00 : f32
      %21 = vector.broadcast %cst_14 : f32 to vector<1x8x32xf32>
      %c0_15 = arith.constant 0 : index
      %c0_16 = arith.constant 0 : index
      %c0_17 = arith.constant 0 : index
      %22 = vector.load %arg6[%c0_15, %c0_16, %c0_17] : memref<1x8x32xf32, #tpu.memory_space<vmem>>, vector<1x8x32xf32>
      tpu.vector_store %arg6[%c0_15, %c0_16, %c0_17], %21 {strides = array<i32>} : memref<1x8x32xf32, #tpu.memory_space<vmem>>, vector<1x8x32xf32>,
    } else {
    }
    %c0 = arith.constant 0 : index
    %c0_1 = arith.constant 0 : index
    %3 = vector.load %arg2[%c0, %c0_1] : memref<16x32xf32, #tpu.memory_space<vmem>>, vector<16x32xf32>
    %c0_2 = arith.constant 0 : index
    %c0_3 = arith.constant 0 : index
    %4 = vector.load %arg3[%c0_2, %c0_3] : memref<16x32xf32, #tpu.memory_space<vmem>>, vector<16x32xf32>
    %5 = arith.subf %3, %4 : vector<16x32xf32>
    %c0_4 = arith.constant 0 : index
    %c0_5 = arith.constant 0 : index
    %6 = vector.load %arg4[%c0_4, %c0_5] : memref<16x1xf32, #tpu.memory_space<vmem>>, vector<16x1xf32>
    %7 = vector.broadcast %6 : vector<16x1xf32> to vector<16x32xf32>
    %8 = arith.mulf %5, %7 : vector<16x32xf32>
    %c1_i32 = arith.constant 1 : i32
    %9 = arith.muli %arg0, %c1_i32 : i32
    %10 = arith.addi %9, %arg1 : i32
    %c16_i32 = arith.constant 16 : i32
    %11 = arith.muli %10, %c16_i32 : i32
    %c16_i32_6 = arith.constant 16 : i32
    %12 = arith.subi %c16_i32_6, %11 : i32
    %c16_i32_7 = arith.constant 16 : i32
    %13 = arith.cmpi sge, %12, %c16_i32_7 : i32
    %14 = arith.extui %13 : i1 to i32
    %c0_i32_8 = arith.constant 0 : i32
    %15 = arith.cmpi ne, %14, %c0_i32_8 : i32
    scf.if %15 {
      %19 = vector.shape_cast %8 : vector<16x32xf32> to vector<2x8x32xf32>
      %20 = arith.mulf %19, %19 : vector<2x8x32xf32>
      %21 = math.absf %19 : vector<2x8x32xf32>
      %c0_11 = arith.constant 0 : index
      %c0_12 = arith.constant 0 : index
      %c0_13 = arith.constant 0 : index
      %22 = vector.load %arg5[%c0_11, %c0_12, %c0_13] : memref<1x8x32xf32, #tpu.memory_space<vmem>>, vector<1x8x32xf32>
      %cst = arith.constant dense<0.000000e+00> : vector<8x32xf32>
      %23 = vector.multi_reduction <add>, %20, %cst [0] : vector<2x8x32xf32> to vector<8x32xf32>
      %24 = vector.shape_cast %23 : vector<8x32xf32> to vector<1x8x32xf32>
      %25 = arith.addf %22, %24 : vector<1x8x32xf32>
      %c0_14 = arith.constant 0 : index
      %c0_15 = arith.constant 0 : index
      %c0_16 = arith.constant 0 : index
      %26 = vector.load %arg5[%c0_14, %c0_15, %c0_16] : memref<1x8x32xf32, #tpu.memory_space<vmem>>, vector<1x8x32xf32>
      tpu.vector_store %arg5[%c0_14, %c0_15, %c0_16], %25 {strides = array<i32>} : memref<1x8x32xf32, #tpu.memory_space<vmem>>, vector<1x8x32xf32>,
      %c0_17 = arith.constant 0 : index
      %c0_18 = arith.constant 0 : index
      %c0_19 = arith.constant 0 : index
      %27 = vector.load %arg6[%c0_17, %c0_18, %c0_19] : memref<1x8x32xf32, #tpu.memory_space<vmem>>, vector<1x8x32xf32>
      %cst_20 = arith.constant dense<0.000000e+00> : vector<8x32xf32>
      %28 = vector.multi_reduction <add>, %21, %cst_20 [0] : vector<2x8x32xf32> to vector<8x32xf32>
      %29 = vector.shape_cast %28 : vector<8x32xf32> to vector<1x8x32xf32>
      %30 = arith.addf %27, %29 : vector<1x8x32xf32>
      %c0_21 = arith.constant 0 : index
      %c0_22 = arith.constant 0 : index
      %c0_23 = arith.constant 0 : index
      %31 = vector.load %arg6[%c0_21, %c0_22, %c0_23] : memref<1x8x32xf32, #tpu.memory_space<vmem>>, vector<1x8x32xf32>
      tpu.vector_store %arg6[%c0_21, %c0_22, %c0_23], %30 {strides = array<i32>} : memref<1x8x32xf32, #tpu.memory_space<vmem>>, vector<1x8x32xf32>,
    } else {
    }
    %c16_i32_9 = arith.constant 16 : i32
    %16 = arith.cmpi slt, %12, %c16_i32_9 : i32
    %17 = arith.extui %16 : i1 to i32
    %c0_i32_10 = arith.constant 0 : i32
    %18 = arith.cmpi ne, %17, %c0_i32_10 : i32
    scf.if %18 {
      %19 = tpu.iota {dimensions = array<i32: 0>} : vector<16x1xi32>
      %20 = vector.broadcast %12 : i32 to vector<16x1xi32>
      %21 = arith.cmpi slt, %19, %20 : vector<16x1xi32>
      %cst = arith.constant 0.000000e+00 : f32
      %22 = vector.shape_cast %21 : vector<16x1xi1> to vector<16x1xi1>
      %23 = vector.broadcast %22 : vector<16x1xi1> to vector<16x32xi1>
      %24 = vector.broadcast %cst : f32 to vector<16x32xf32>
      %25 = arith.select %23, %8, %24 : vector<16x32xi1>, vector<16x32xf32>
      %26 = vector.shape_cast %25 : vector<16x32xf32> to vector<2x8x32xf32>
      %27 = arith.mulf %26, %26 : vector<2x8x32xf32>
      %28 = math.absf %26 : vector<2x8x32xf32>
      %c0_11 = arith.constant 0 : index
      %c0_12 = arith.constant 0 : index
      %c0_13 = arith.constant 0 : index
      %29 = vector.load %arg5[%c0_11, %c0_12, %c0_13] : memref<1x8x32xf32, #tpu.memory_space<vmem>>, vector<1x8x32xf32>
      %cst_14 = arith.constant dense<0.000000e+00> : vector<8x32xf32>
      %30 = vector.multi_reduction <add>, %27, %cst_14 [0] : vector<2x8x32xf32> to vector<8x32xf32>
      %31 = vector.shape_cast %30 : vector<8x32xf32> to vector<1x8x32xf32>
      %32 = arith.addf %29, %31 : vector<1x8x32xf32>
      %c0_15 = arith.constant 0 : index
      %c0_16 = arith.constant 0 : index
      %c0_17 = arith.constant 0 : index
      %33 = vector.load %arg5[%c0_15, %c0_16, %c0_17] : memref<1x8x32xf32, #tpu.memory_space<vmem>>, vector<1x8x32xf32>
      tpu.vector_store %arg5[%c0_15, %c0_16, %c0_17], %32 {strides = array<i32>} : memref<1x8x32xf32, #tpu.memory_space<vmem>>, vector<1x8x32xf32>,
      %c0_18 = arith.constant 0 : index
      %c0_19 = arith.constant 0 : index
      %c0_20 = arith.constant 0 : index
      %34 = vector.load %arg6[%c0_18, %c0_19, %c0_20] : memref<1x8x32xf32, #tpu.memory_space<vmem>>, vector<1x8x32xf32>
      %cst_21 = arith.constant dense<0.000000e+00> : vector<8x32xf32>
      %35 = vector.multi_reduction <add>, %28, %cst_21 [0] : vector<2x8x32xf32> to vector<8x32xf32>
      %36 = vector.shape_cast %35 : vector<8x32xf32> to vector<1x8x32xf32>
      %37 = arith.addf %34, %36 : vector<1x8x32xf32>
      %c0_22 = arith.constant 0 : index
      %c0_23 = arith.constant 0 : index
      %c0_24 = arith.constant 0 : index
      %38 = vector.load %arg6[%c0_22, %c0_23, %c0_24] : memref<1x8x32xf32, #tpu.memory_space<vmem>>, vector<1x8x32xf32>
      tpu.vector_store %arg6[%c0_22, %c0_23, %c0_24], %37 {strides = array<i32>} : memref<1x8x32xf32, #tpu.memory_space<vmem>>, vector<1x8x32xf32>,
    } else {
    }
    return
  }
  func.func @transform_0(%arg0: i32, %arg1: i32) -> (i32, i32) {
    %c1_i32 = arith.constant 1 : i32
    %0 = arith.muli %arg0, %c1_i32 : i32
    %1 = arith.addi %0, %arg1 : i32
    %c0_i32 = arith.constant 0 : i32
    %2 = arith.minsi %1, %c0_i32 : i32
    %c0_i32_0 = arith.constant 0 : i32
    %c0_i32_1 = arith.constant 0 : i32
    return %2, %c0_i32_0 : i32, i32
  }
  func.func @transform_1(%arg0: i32, %arg1: i32) -> (i32, i32) {
    %c1_i32 = arith.constant 1 : i32
    %0 = arith.muli %arg0, %c1_i32 : i32
    %1 = arith.addi %0, %arg1 : i32
    %c0_i32 = arith.constant 0 : i32
    %2 = arith.minsi %1, %c0_i32 : i32
    %c0_i32_0 = arith.constant 0 : i32
    %c0_i32_1 = arith.constant 0 : i32
    return %2, %c0_i32_0 : i32, i32
  }
  func.func @transform_2(%arg0: i32, %arg1: i32) -> (i32, i32) {
    %c1_i32 = arith.constant 1 : i32
    %0 = arith.muli %arg0, %c1_i32 : i32
    %1 = arith.addi %0, %arg1 : i32
    %c0_i32 = arith.constant 0 : i32
    %2 = arith.minsi %1, %c0_i32 : i32
    %c0_i32_0 = arith.constant 0 : i32
    %c0_i32_1 = arith.constant 0 : i32
    return %2, %c0_i32_0 : i32, i32
  }
  func.func @transform_3(%arg0: i32, %arg1: i32) -> (i32, i32, i32) {
    %c0_i32 = arith.constant 0 : i32
    %c0_i32_0 = arith.constant 0 : i32
    %c0_i32_1 = arith.constant 0 : i32
    return %arg0, %c0_i32, %c0_i32_0 : i32, i32, i32
  }
  func.func @transform_4(%arg0: i32, %arg1: i32) -> (i32, i32, i32) {
    %c0_i32 = arith.constant 0 : i32
    %c0_i32_0 = arith.constant 0 : i32
    %c0_i32_1 = arith.constant 0 : i32
    return %arg0, %c0_i32, %c0_i32_0 : i32, i32, i32
  }
}

</mosaic_0001>

<bundles_post_ra>
// kernel: diffusion_loss.1
= control target key start
LH: loop header
LB: loop body
LE: loop exit
PB: predicated region body
PF: predicated region fallthrough
CT: control target
= control target key end

     0   :  { %10 = vsyncpa [#allocation3], 0  ;;  %s241_s15 = smov [#allocation2]   ;;  %s321_s0 = inlined_call_operand.vmem [shape: f32[16,32], index: 0, kind: input, shape index: {}]   ;;  %s322_s1 = inlined_call_operand.hbm [shape: f32[16,32], index: 1, kind: input, shape index: {}]   ;;  %s323_s2 = inlined_call_operand.vmem [shape: f32[16,1], index: 2, kind: input, shape index: {}]   ;;  %s324_s3 = inlined_call_operand.vmem [shape: f32[1,8,32], index: 3, kind: output, shape index: {0}]   ;;  %s325_s4 = inlined_call_operand.vmem [shape: f32[1,8,32], index: 4, kind: output, shape index: {1}]  }
   0x1   :  { %s36_s16 = sshll.u32 %s241_s15, 4  ;;  %s217_s19 = scalar_lea.hbm %s322_s1, 256  ;;  %s37_s16 = int_to_ptr.vmem [resolvable:$true] %s36_s16 }
   0x2   :  { %p218_p0 = scmp.ne.s32.totalorder %s322_s1, %s217_s19  ;;  %p221_p1 = scmp.lt.u32.totalorder %s217_s19, %s322_s1 }
   0x4   :  { %p223_p2 = pnand %p221_p1, %p218_p0 }
   0x6   :  { %226 = shalt.err (!%p223_p2)
}
   0x7   :  { %s227_s24 = scalar_lea.vmem %s37_s16, 256  ;;  %p232_p4 = scmp.lt.s32.totalorder %s37_s16, %s37_s16 }
   0x8   :  { %p228_p3 = scmp.ne.s32.totalorder %s37_s16, %s227_s24  ;;  %p233_p5 = scmp.lt.s32.totalorder %s227_s24, %s227_s24 }
   0xa   :  { %p234_p6 = por %p233_p5, %p232_p4 }
   0xc   :  { %p235_p7 = pnand %p234_p6, %p228_p3 }
   0xe   :  { %238 = shalt.err (!%p235_p7)
}
   0xf   :  { %s242_s25 = smov 128   ;;  %s243_s26 = smov 8  }
  0x10   :  { %42 = dma.hbm_to_vmem [thread:$0]  %s322_s1, 256, %s37_s16, [#allocation3], %s242_s25, %s242_s25, %s243_s26  }
  0x11   :  { %239 = dma.done.wait [#allocation3], 256  }
  0x12   :  { %240 = vsyncadd [#allocation3], 4294967040  ;;  %v244_v0 = vmov 0   ;;  %v117_v1 = vld [vmem:[%s323_s2] sm:$0xff]  ;;  %vm108_vm0 = vcmask 261120   ;;  %v118_v2 = vld [vmem:[%s323_s2 + $0x8] sm:$0xff] }
  0x13   :  { %216 = vset.pattern.permute.xlu0 %v244_v0  ;;  %v245_v3 = vmov 0.0   ;;  %v111_v4 = vld [vmem:[%s321_s0] sm:$0xff]  ;;  %v112_v7 = vld [vmem:[%s321_s0 + $0x8] sm:$0xff] }
  0x14   :  { %121 = vperm.xlu0 %216, %v117_v1   ;;  %109 = vst.msk [vmem:[%s324_s3] sm:$0xff] %vm108_vm0, %v245_v3  ;;  %110 = vst.msk [vmem:[%s325_s4] sm:$0xff] %vm108_vm0, %v245_v3  ;;  %v113_v5 = vld [vmem:[#allocation2] sm:$0xff]  ;;  %v114_v8 = vld [vmem:[#allocation2 + $0x8] sm:$0xff] }
  0x15   :  { %v115_v6 = vsub.f32 %v111_v4, %v113_v5  ;;  %v116_v11 = vsub.f32 %v112_v7, %v114_v8 }
  0x18   :  { %126 = vperm.xlu0 %216, %v118_v2  }
  0x1b   :  { %v142_v20 = vld [vmem:[%s324_s3] sm:$0xff] }
  0x1c   :  { %v149_v22 = vld [vmem:[%s325_s4] sm:$0xff] }
  0x93   :  { %v122_v9 = vpop.permute.xlu0 %121 }
  0x94   :  { %v129_v10 = vmul.f32 %v122_v9, %v115_v6 }
  0x96   :  { %v138_v13 = vmul.f32 %v129_v10, %v129_v10  ;;  %v140_v14 = vand.u32 2147483647, %v129_v10 }
  0x97   :  { %v127_v12 = vpop.permute.xlu0 %126 }
  0x98   :  { %v130_v15 = vmul.f32 %v127_v12, %v116_v11  ;;  %v144_v18 = vsel %vm108_vm0, %v138_v13, 0.0  ;;  %v150_v19 = vsel %vm108_vm0, %v140_v14, 0.0 }
  0x9a   :  { %v139_v16 = vmul.f32 %v130_v15, %v130_v15  ;;  %v141_v17 = vand.u32 2147483647, %v130_v15 }
  0x9c   :  { %v145_v21 = vsel %vm108_vm0, %v139_v16, 0.0  ;;  %v151_v23 = vsel %vm108_vm0, %v141_v17, 0.0 }
  0x9d   :  { %v146_v24 = vadd.f32 %v145_v21, %v144_v18  ;;  %v152_v25 = vadd.f32 %v151_v23, %v150_v19 }
  0x9f   :  { %v147_v26 = vadd.f32 %v146_v24, %v142_v20  ;;  %v153_v27 = vadd.f32 %v152_v25, %v149_v22 }
  0xa1   :  { %148 = vst.msk [vmem:[%s324_s3] sm:$0xff] %vm108_vm0, %v147_v26  ;;  %154 = vst.msk [vmem:[%s325_s4] sm:$0xff] %vm108_vm0, %v153_v27 }
  0xa2   :  { %196 = vsyncpa [#allocation3], 1 }

</bundles_post_ra>
